<compile_context>
chip_gen: v7x
topology: tpu7x:2x2x1
jax: 0.10.0
libtpu: 0.0.40
codegen_flags: <defaults>
</compile_context>

<pallas_src>
import jax
import jax.numpy as jnp
from jax.experimental import pallas as pl
from jax.experimental.pallas import tpu as pltpu

HIDDEN = 256
LN_EPS = 1e-5


def _ln_relu(h, g, be):
    """LayerNorm (biased var, matches torch) + affine + ReLU, f32 stats."""
    mu = jnp.mean(h, axis=-1, keepdims=True)
    c = h - mu                                   # center once, reuse
    var = jnp.mean(c * c, axis=-1, keepdims=True)
    scale = g * jax.lax.rsqrt(var + LN_EPS)      # fold gamma into rsqrt factor (EUP)
    return jnp.maximum(c * scale + be, 0.0)


def _critic_kernel(x_ref,
                   w1_ref, b1_ref, g1_ref, be1_ref,
                   w2_ref, b2_ref, g2_ref, be2_ref,
                   w3_ref, b3_ref,
                   o_ref):
    mm_dtype = w1_ref.dtype    # weights arrive pre-cast; only cast activations

    # --- Linear 1 (single fused GEMM over the concatenated input) ---
    h = jnp.dot(x_ref[...].astype(mm_dtype), w1_ref[...],
                preferred_element_type=jnp.float32) + b1_ref[...]
    h = _ln_relu(h, g1_ref[...], be1_ref[...])

    # --- Linear 2 + LayerNorm + ReLU ---
    h = jnp.dot(h.astype(mm_dtype), w2_ref[...],
                preferred_element_type=jnp.float32) + b2_ref[...]
    h = _ln_relu(h, g2_ref[...], be2_ref[...])

    # --- Output head 256 -> 1 on the VPU/XLU (N=1 MXU matmul wastes columns) ---
    q = jnp.sum(h * w3_ref[...], axis=-1, keepdims=True) + b3_ref[...]
    o_ref[...] = q.astype(o_ref.dtype)


def critico_forward(obs, acao, params, *, matmul_dtype=jnp.bfloat16, block_b=None):
    """Critic forward: Linear -> LN -> ReLU -> Linear -> LN -> ReLU -> Linear(->1)."""
    obs = obs.astype(jnp.float32)
    acao = acao.astype(jnp.float32)
    x = jnp.concatenate([obs, acao], axis=-1)     # one lane-dense input slab
    B, d_in = x.shape

    # Batch tile: big enough to amortize the ~0.35us/grid-step overhead
    # (cap 2048), but split so there are >= 2 grid steps whenever B allows,
    # so the "parallel" batch axis shards across both v7x TensorCores.
    if block_b is None:
        half = -(-B // 2)                         # cdiv(B, 2)
        block_b = min(2048, max(8, -(-half // 8) * 8))
    tb = block_b
    nb = -(-B // tb)                              # cdiv; last block may be partial

    # Weights pre-cast once here (no in-kernel per-step casts); LN/head stay f32.
    w1 = params["w1"].astype(matmul_dtype)
    w2 = params["w2"].astype(matmul_dtype)

    def wspec(shape):                             # VMEM-resident across grid steps
        return pl.BlockSpec(shape, lambda i: (0, 0))

    in_specs = [
        pl.BlockSpec((tb, d_in), lambda i: (i, 0)),                   # x (batch-tiled)
        wspec((d_in, HIDDEN)),                                        # W1
        wspec((1, HIDDEN)), wspec((1, HIDDEN)), wspec((1, HIDDEN)),   # b1, g1, be1
        wspec((HIDDEN, HIDDEN)),                                      # W2
        wspec((1, HIDDEN)), wspec((1, HIDDEN)), wspec((1, HIDDEN)),   # b2, g2, be2
        wspec((1, HIDDEN)),                                           # w3 row
        wspec((1, 1)),                                                # b3
    ]
    out_spec = pl.BlockSpec((tb, 1), lambda i: (i, 0))

    itemsize = jnp.dtype(matmul_dtype).itemsize
    weight_bytes = (d_in * HIDDEN + HIDDEN * HIDDEN) * itemsize + (8 * HIDDEN + 2) * 4
    cost = pl.CostEstimate(
        flops=2 * B * (d_in * HIDDEN + HIDDEN * HIDDEN + HIDDEN) + 12 * B * HIDDEN,
        transcendentals=2 * B,
        bytes_accessed=4 * B * (d_in + 1) + weight_bytes,
    )

    # VMEM budget: double-buffered activation blocks + resident weights + a few
    # live (tb, 256) f32 temporaries; floor at 32 MiB so large tiles don't hit
    # v5e's 16 MiB default scoped limit (safe vs physical VMEM on v5e/v6e/v7x).
    est = 2 * tb * (d_in + 1) * 4 + 2 * weight_bytes + 6 * tb * HIDDEN * 4
    vmem_limit = max(32 * 1024 * 1024, int(est))

    out = pl.pallas_call(
        _critic_kernel,
        out_shape=jax.ShapeDtypeStruct((B, 1), jnp.float32),
        grid=(nb,),
        in_specs=in_specs,
        out_specs=out_spec,
        compiler_params=pltpu.CompilerParams(
            dimension_semantics=("parallel",),
            vmem_limit_bytes=vmem_limit),
        cost_estimate=cost,
    )(x, w1,
      params["b1"], params["g1"], params["be1"],
      w2, params["b2"], params["g2"], params["be2"],
      params["w3"], params["b3"])
    return out


def init_params(key, obs_dim, acao_dim):
    """Deterministic init mimicking PyTorch defaults (uniform +-1/sqrt(fan_in)),
    output head re-initialized to uniform(-0.003, 0.003)."""
    d_in = obs_dim + acao_dim
    ks = jax.random.split(key, 6)

    def lin(kw, kb, fan_in, fan_out):
        bound = 1.0 / jnp.sqrt(fan_in)
        w = jax.random.uniform(kw, (fan_in, fan_out), jnp.float32, -bound, bound)
        b = jax.random.uniform(kb, (1, fan_out), jnp.float32, -bound, bound)
        return w, b

    w1, b1 = lin(ks[0], ks[1], d_in, HIDDEN)
    w2, b2 = lin(ks[2], ks[3], HIDDEN, HIDDEN)
    w3 = jax.random.uniform(ks[4], (1, HIDDEN), jnp.float32, -0.003, 0.003)  # row form
    b3 = jax.random.uniform(ks[5], (1, 1), jnp.float32, -0.003, 0.003)

    return {
        "w1": w1, "b1": b1,
        "g1": jnp.ones((1, HIDDEN), jnp.float32), "be1": jnp.zeros((1, HIDDEN), jnp.float32),
        "w2": w2, "b2": b2,
        "g2": jnp.ones((1, HIDDEN), jnp.float32), "be2": jnp.zeros((1, HIDDEN), jnp.float32),
        "w3": w3, "b3": b3,
    }


def _reference(obs, acao, p):
    """Pure-JAX reference of the same forward, for a sanity check."""
    x = jnp.concatenate([obs, acao], axis=-1)

    def ln(h, g, b):
        mu = jnp.mean(h, axis=-1, keepdims=True)
        var = jnp.mean((h - mu) ** 2, axis=-1, keepdims=True)
        return (h - mu) / jnp.sqrt(var + LN_EPS) * g + b

    h = jnp.maximum(ln(x @ p["w1"] + p["b1"], p["g1"], p["be1"]), 0.0)
    h = jnp.maximum(ln(h @ p["w2"] + p["b2"], p["g2"], p["be2"]), 0.0)
    return h @ p["w3"].T + p["b3"]


if __name__ == "__main__":
    obs_dim, acao_dim, batch = 16, 8, 8
    key = jax.random.PRNGKey(0)
    k_obs, k_acao, k_params = jax.random.split(key, 3)

    obs = jax.random.normal(k_obs, (batch, obs_dim), jnp.float32)
    acao = jax.random.normal(k_acao, (batch, acao_dim), jnp.float32)
    params = init_params(k_params, obs_dim, acao_dim)

    q_ref = _reference(obs, acao, params)

    # f32 MXU-operand path (bit-faithful to the PyTorch module's f32 semantics).
    q = critico_forward(obs, acao, params, matmul_dtype=jnp.float32)
    jax.block_until_ready(q)
    assert q.shape == (batch, 1)
    assert jnp.allclose(q, q_ref, atol=1e-5, rtol=1e-5)

    # Default bf16 MXU-operand path (f32 accumulation, f32 LN stats).
    q_bf16 = critico_forward(obs, acao, params)
    jax.block_until_ready(q_bf16)
    assert q_bf16.shape == (batch, 1)
    assert jnp.allclose(q_bf16, q_ref, atol=5e-2, rtol=5e-2)

    # Exercise the gridded + ragged (partial last block, no jnp.pad) path:
    # B=20 with a forced 8-row tile -> 3 grid steps, last block partially valid.
    obs2 = jax.random.normal(k_obs, (20, obs_dim), jnp.float32)
    acao2 = jax.random.normal(k_acao, (20, acao_dim), jnp.float32)
    q2 = critico_forward(obs2, acao2, params, matmul_dtype=jnp.float32, block_b=8)
    jax.block_until_ready(q2)
    assert q2.shape == (20, 1)
    assert jnp.allclose(q2, _reference(obs2, acao2, params), atol=1e-5, rtol=1e-5)

    print("KERNEL_OK")
</pallas_src>

<mosaic_0001>
module attributes {stable_mosaic.version = 11 : i64} {
  func.func @_critic_kernel(%arg0: i32, %arg1: memref<8x24xf32, #tpu.memory_space<vmem>>, %arg2: memref<24x256xf32, #tpu.memory_space<vmem>>, %arg3: memref<1x256xf32, #tpu.memory_space<vmem>>, %arg4: memref<1x256xf32, #tpu.memory_space<vmem>>, %arg5: memref<1x256xf32, #tpu.memory_space<vmem>>, %arg6: memref<256x256xf32, #tpu.memory_space<vmem>>, %arg7: memref<1x256xf32, #tpu.memory_space<vmem>>, %arg8: memref<1x256xf32, #tpu.memory_space<vmem>>, %arg9: memref<1x256xf32, #tpu.memory_space<vmem>>, %arg10: memref<1x256xf32, #tpu.memory_space<vmem>>, %arg11: memref<1x1xf32, #tpu.memory_space<vmem>>, %arg12: memref<8x1xf32, #tpu.memory_space<vmem>>) attributes {dimension_semantics = [#tpu.dimension_semantics<parallel>], iteration_bounds = array<i64: 1>, scalar_prefetch = 0 : i64, scratch_operands = 0 : i64, tpu.core_type = #tpu.core_type<tc>, window_params = [{transform_indices = @transform_0, window_bounds = array<i64: 8, 24>}, {pipeline_mode = #tpu.pipeline_mode<synchronous>, transform_indices = @transform_1, window_bounds = array<i64: 24, 256>}, {pipeline_mode = #tpu.pipeline_mode<synchronous>, transform_indices = @transform_2, window_bounds = array<i64: 1, 256>}, {pipeline_mode = #tpu.pipeline_mode<synchronous>, transform_indices = @transform_3, window_bounds = array<i64: 1, 256>}, {pipeline_mode = #tpu.pipeline_mode<synchronous>, transform_indices = @transform_4, window_bounds = array<i64: 1, 256>}, {pipeline_mode = #tpu.pipeline_mode<synchronous>, transform_indices = @transform_5, window_bounds = array<i64: 256, 256>}, {pipeline_mode = #tpu.pipeline_mode<synchronous>, transform_indices = @transform_6, window_bounds = array<i64: 1, 256>}, {pipeline_mode = #tpu.pipeline_mode<synchronous>, transform_indices = @transform_7, window_bounds = array<i64: 1, 256>}, {pipeline_mode = #tpu.pipeline_mode<synchronous>, transform_indices = @transform_8, window_bounds = array<i64: 1, 256>}, {pipeline_mode = #tpu.pipeline_mode<synchronous>, transform_indices = @transform_9, window_bounds = array<i64: 1, 256>}, {pipeline_mode = #tpu.pipeline_mode<synchronous>, transform_indices = @transform_10, window_bounds = array<i64: 1, 1>}, {transform_indices = @transform_11, window_bounds = array<i64: 8, 1>}]} {
    %c0 = arith.constant 0 : index
    %c0_0 = arith.constant 0 : index
    %0 = vector.load %arg1[%c0, %c0_0] : memref<8x24xf32, #tpu.memory_space<vmem>>, vector<8x24xf32>
    %c0_1 = arith.constant 0 : index
    %c0_2 = arith.constant 0 : index
    %1 = vector.load %arg2[%c0_1, %c0_2] : memref<24x256xf32, #tpu.memory_space<vmem>>, vector<24x256xf32>
    %cst = arith.constant dense<0.000000e+00> : vector<8x256xf32>
    %2 = tpu.matmul %0, %1, %cst {dimension_numbers = #tpu.dot_dimension_numbers<[1], [0], [0], [1], [0, 0, 1, 1], [], []>} : vector<8x24xf32>, vector<24x256xf32>, vector<8x256xf32> -> vector<8x256xf32>
    %c0_3 = arith.constant 0 : index
    %c0_4 = arith.constant 0 : index
    %3 = vector.load %arg3[%c0_3, %c0_4] : memref<1x256xf32, #tpu.memory_space<vmem>>, vector<1x256xf32>
    %4 = vector.broadcast %3 : vector<1x256xf32> to vector<8x256xf32>
    %5 = arith.addf %2, %4 : vector<8x256xf32>
    %c0_5 = arith.constant 0 : index
    %c0_6 = arith.constant 0 : index
    %6 = vector.load %arg4[%c0_5, %c0_6] : memref<1x256xf32, #tpu.memory_space<vmem>>, vector<1x256xf32>
    %c0_7 = arith.constant 0 : index
    %c0_8 = arith.constant 0 : index
    %7 = vector.load %arg5[%c0_7, %c0_8] : memref<1x256xf32, #tpu.memory_space<vmem>>, vector<1x256xf32>
    %cst_9 = arith.constant dense<0.000000e+00> : vector<8xf32>
    %8 = vector.multi_reduction <add>, %5, %cst_9 [1] : vector<8x256xf32> to vector<8xf32>
    %9 = vector.shape_cast %8 : vector<8xf32> to vector<8x1xf32>
    %cst_10 = arith.constant 2.560000e+02 : f32
    %10 = vector.broadcast %cst_10 : f32 to vector<8x1xf32>
    %11 = arith.divf %9, %10 : vector<8x1xf32>
    %12 = vector.broadcast %11 : vector<8x1xf32> to vector<8x256xf32>
    %13 = arith.subf %5, %12 : vector<8x256xf32>
    %14 = arith.mulf %13, %13 : vector<8x256xf32>
    %cst_11 = arith.constant dense<0.000000e+00> : vector<8xf32>
    %15 = vector.multi_reduction <add>, %14, %cst_11 [1] : vector<8x256xf32> to vector<8xf32>
    %16 = vector.shape_cast %15 : vector<8xf32> to vector<8x1xf32>
    %cst_12 = arith.constant 2.560000e+02 : f32
    %17 = vector.broadcast %cst_12 : f32 to vector<8x1xf32>
    %18 = arith.divf %16, %17 : vector<8x1xf32>
    %cst_13 = arith.constant 9.99999974E-6 : f32
    %19 = vector.broadcast %cst_13 : f32 to vector<8x1xf32>
    %20 = arith.addf %18, %19 : vector<8x1xf32>
    %21 = math.rsqrt %20 : vector<8x1xf32>
    %22 = vector.broadcast %6 : vector<1x256xf32> to vector<8x256xf32>
    %23 = vector.broadcast %21 : vector<8x1xf32> to vector<8x256xf32>
    %24 = arith.mulf %22, %23 : vector<8x256xf32>
    %25 = arith.mulf %13, %24 : vector<8x256xf32>
    %26 = vector.broadcast %7 : vector<1x256xf32> to vector<8x256xf32>
    %27 = arith.addf %25, %26 : vector<8x256xf32>
    %cst_14 = arith.constant 0.000000e+00 : f32
    %28 = vector.broadcast %cst_14 : f32 to vector<8x256xf32>
    %29 = arith.maximumf %27, %28 : vector<8x256xf32>
    %c0_15 = arith.constant 0 : index
    %c0_16 = arith.constant 0 : index
    %30 = vector.load %arg6[%c0_15, %c0_16] : memref<256x256xf32, #tpu.memory_space<vmem>>, vector<256x256xf32>
    %cst_17 = arith.constant dense<0.000000e+00> : vector<8x256xf32>
    %31 = tpu.matmul %29, %30, %cst_17 {dimension_numbers = #tpu.dot_dimension_numbers<[1], [0], [0], [1], [0, 0, 1, 1], [], []>} : vector<8x256xf32>, vector<256x256xf32>, vector<8x256xf32> -> vector<8x256xf32>
    %c0_18 = arith.constant 0 : index
    %c0_19 = arith.constant 0 : index
    %32 = vector.load %arg7[%c0_18, %c0_19] : memref<1x256xf32, #tpu.memory_space<vmem>>, vector<1x256xf32>
    %33 = vector.broadcast %32 : vector<1x256xf32> to vector<8x256xf32>
    %34 = arith.addf %31, %33 : vector<8x256xf32>
    %c0_20 = arith.constant 0 : index
    %c0_21 = arith.constant 0 : index
    %35 = vector.load %arg8[%c0_20, %c0_21] : memref<1x256xf32, #tpu.memory_space<vmem>>, vector<1x256xf32>
    %c0_22 = arith.constant 0 : index
    %c0_23 = arith.constant 0 : index
    %36 = vector.load %arg9[%c0_22, %c0_23] : memref<1x256xf32, #tpu.memory_space<vmem>>, vector<1x256xf32>
    %cst_24 = arith.constant dense<0.000000e+00> : vector<8xf32>
    %37 = vector.multi_reduction <add>, %34, %cst_24 [1] : vector<8x256xf32> to vector<8xf32>
    %38 = vector.shape_cast %37 : vector<8xf32> to vector<8x1xf32>
    %cst_25 = arith.constant 2.560000e+02 : f32
    %39 = vector.broadcast %cst_25 : f32 to vector<8x1xf32>
    %40 = arith.divf %38, %39 : vector<8x1xf32>
    %41 = vector.broadcast %40 : vector<8x1xf32> to vector<8x256xf32>
    %42 = arith.subf %34, %41 : vector<8x256xf32>
    %43 = arith.mulf %42, %42 : vector<8x256xf32>
    %cst_26 = arith.constant dense<0.000000e+00> : vector<8xf32>
    %44 = vector.multi_reduction <add>, %43, %cst_26 [1] : vector<8x256xf32> to vector<8xf32>
    %45 = vector.shape_cast %44 : vector<8xf32> to vector<8x1xf32>
    %cst_27 = arith.constant 2.560000e+02 : f32
    %46 = vector.broadcast %cst_27 : f32 to vector<8x1xf32>
    %47 = arith.divf %45, %46 : vector<8x1xf32>
    %cst_28 = arith.constant 9.99999974E-6 : f32
    %48 = vector.broadcast %cst_28 : f32 to vector<8x1xf32>
    %49 = arith.addf %47, %48 : vector<8x1xf32>
    %50 = math.rsqrt %49 : vector<8x1xf32>
    %51 = vector.broadcast %35 : vector<1x256xf32> to vector<8x256xf32>
    %52 = vector.broadcast %50 : vector<8x1xf32> to vector<8x256xf32>
    %53 = arith.mulf %51, %52 : vector<8x256xf32>
    %54 = arith.mulf %42, %53 : vector<8x256xf32>
    %55 = vector.broadcast %36 : vector<1x256xf32> to vector<8x256xf32>
    %56 = arith.addf %54, %55 : vector<8x256xf32>
    %cst_29 = arith.constant 0.000000e+00 : f32
    %57 = vector.broadcast %cst_29 : f32 to vector<8x256xf32>
    %58 = arith.maximumf %56, %57 : vector<8x256xf32>
    %c0_30 = arith.constant 0 : index
    %c0_31 = arith.constant 0 : index
    %59 = vector.load %arg10[%c0_30, %c0_31] : memref<1x256xf32, #tpu.memory_space<vmem>>, vector<1x256xf32>
    %60 = vector.broadcast %59 : vector<1x256xf32> to vector<8x256xf32>
    %61 = arith.mulf %58, %60 : vector<8x256xf32>
    %cst_32 = arith.constant dense<0.000000e+00> : vector<8xf32>
    %62 = vector.multi_reduction <add>, %61, %cst_32 [1] : vector<8x256xf32> to vector<8xf32>
    %63 = vector.shape_cast %62 : vector<8xf32> to vector<8x1xf32>
    %c0_33 = arith.constant 0 : index
    %c0_34 = arith.constant 0 : index
    %64 = vector.load %arg11[%c0_33, %c0_34] : memref<1x1xf32, #tpu.memory_space<vmem>>, vector<1x1xf32>
    %65 = vector.broadcast %64 : vector<1x1xf32> to vector<8x1xf32>
    %66 = arith.addf %63, %65 : vector<8x1xf32>
    %c0_35 = arith.constant 0 : index
    %c0_36 = arith.constant 0 : index
    %67 = vector.load %arg12[%c0_35, %c0_36] : memref<8x1xf32, #tpu.memory_space<vmem>>, vector<8x1xf32>
    tpu.vector_store %arg12[%c0_35, %c0_36], %66 {strides = array<i32>} : memref<8x1xf32, #tpu.memory_space<vmem>>, vector<8x1xf32>,
    return
  }
  func.func @transform_0(%arg0: i32) -> (i32, i32) {
    %c0_i32 = arith.constant 0 : i32
    %c0_i32_0 = arith.constant 0 : i32
    return %arg0, %c0_i32 : i32, i32
  }
  func.func @transform_1(%arg0: i32) -> (i32, i32) {
    %c0_i32 = arith.constant 0 : i32
    %c0_i32_0 = arith.constant 0 : i32
    %c0_i32_1 = arith.constant 0 : i32
    return %c0_i32, %c0_i32_0 : i32, i32
  }
  func.func @transform_2(%arg0: i32) -> (i32, i32) {
    %c0_i32 = arith.constant 0 : i32
    %c0_i32_0 = arith.constant 0 : i32
    %c0_i32_1 = arith.constant 0 : i32
    return %c0_i32, %c0_i32_0 : i32, i32
  }
  func.func @transform_3(%arg0: i32) -> (i32, i32) {
    %c0_i32 = arith.constant 0 : i32
    %c0_i32_0 = arith.constant 0 : i32
    %c0_i32_1 = arith.constant 0 : i32
    return %c0_i32, %c0_i32_0 : i32, i32
  }
  func.func @transform_4(%arg0: i32) -> (i32, i32) {
    %c0_i32 = arith.constant 0 : i32
    %c0_i32_0 = arith.constant 0 : i32
    %c0_i32_1 = arith.constant 0 : i32
    return %c0_i32, %c0_i32_0 : i32, i32
  }
  func.func @transform_5(%arg0: i32) -> (i32, i32) {
    %c0_i32 = arith.constant 0 : i32
    %c0_i32_0 = arith.constant 0 : i32
    %c0_i32_1 = arith.constant 0 : i32
    return %c0_i32, %c0_i32_0 : i32, i32
  }
  func.func @transform_6(%arg0: i32) -> (i32, i32) {
    %c0_i32 = arith.constant 0 : i32
    %c0_i32_0 = arith.constant 0 : i32
    %c0_i32_1 = arith.constant 0 : i32
    return %c0_i32, %c0_i32_0 : i32, i32
  }
  func.func @transform_7(%arg0: i32) -> (i32, i32) {
    %c0_i32 = arith.constant 0 : i32
    %c0_i32_0 = arith.constant 0 : i32
    %c0_i32_1 = arith.constant 0 : i32
    return %c0_i32, %c0_i32_0 : i32, i32
  }
  func.func @transform_8(%arg0: i32) -> (i32, i32) {
    %c0_i32 = arith.constant 0 : i32
    %c0_i32_0 = arith.constant 0 : i32
    %c0_i32_1 = arith.constant 0 : i32
    return %c0_i32, %c0_i32_0 : i32, i32
  }
  func.func @transform_9(%arg0: i32) -> (i32, i32) {
    %c0_i32 = arith.constant 0 : i32
    %c0_i32_0 = arith.constant 0 : i32
    %c0_i32_1 = arith.constant 0 : i32
    return %c0_i32, %c0_i32_0 : i32, i32
  }
  func.func @transform_10(%arg0: i32) -> (i32, i32) {
    %c0_i32 = arith.constant 0 : i32
    %c0_i32_0 = arith.constant 0 : i32
    %c0_i32_1 = arith.constant 0 : i32
    return %c0_i32, %c0_i32_0 : i32, i32
  }
  func.func @transform_11(%arg0: i32) -> (i32, i32) {
    %c0_i32 = arith.constant 0 : i32
    %c0_i32_0 = arith.constant 0 : i32
    return %arg0, %c0_i32 : i32, i32
  }
}

</mosaic_0001>

<bundles_post_ra>
// kernel: tpu_custom_call.1
= control target key start
LH: loop header
LB: loop body
LE: loop exit
PB: predicated region body
PF: predicated region fallthrough
CT: control target
= control target key end

     0   :  { %s767_s0 = inlined_call_operand.hbm [shape: f32[8,24], index: 0, kind: input, shape index: {}]   ;;  %s768_s1 = inlined_call_operand.hbm [shape: f32[24,256], index: 1, kind: input, shape index: {}]   ;;  %s769_s2 = inlined_call_operand.vmem [shape: f32[1,256], index: 2, kind: input, shape index: {}]   ;;  %s770_s3 = inlined_call_operand.vmem [shape: f32[1,256], index: 3, kind: input, shape index: {}]   ;;  %s771_s4 = inlined_call_operand.vmem [shape: f32[1,256], index: 4, kind: input, shape index: {}]   ;;  %s772_s5 = inlined_call_operand.hbm [shape: f32[256,256], index: 5, kind: input, shape index: {}]   ;;  %s773_s6 = inlined_call_operand.vmem [shape: f32[1,256], index: 6, kind: input, shape index: {}]   ;;  %s774_s7 = inlined_call_operand.vmem [shape: f32[1,256], index: 7, kind: input, shape index: {}]   ;;  %s775_s8 = inlined_call_operand.vmem [shape: f32[1,256], index: 8, kind: input, shape index: {}]   ;;  %s776_s9 = inlined_call_operand.vmem [shape: f32[1,256], index: 9, kind: input, shape index: {}]   ;;  %s777_s10 = inlined_call_operand.<no memory space> [shape: f32[1,1], index: 10, kind: input, shape index: {}]   ;;  %s778_s11 = inlined_call_operand.vmem [shape: f32[8,1], index: 11, kind: output, shape index: {}]  }
   0x1   :  { %v16_v0 = vstv %s777_s10 }
   0x2   :  { %17 = vst [vmem:[#allocation2] sm:$0x1] %v16_v0 }
   0x3   :  { %18 = vsyncpa [#allocation4], 0 }
   0x4   :  { %19 = vsyncpa [#allocation6], 0  ;;  %s596_s19 = smov [#allocation5]   ;;  %s526_s23 = scalar_lea.hbm %s768_s1, 768 }
   0x5   :  { %s35_s20 = sshll.u32 %s596_s19, 4  ;;  %p527_p0 = scmp.ne.s32.totalorder %s768_s1, %s526_s23  ;;  %s36_s20 = int_to_ptr.vmem [resolvable:$true] %s35_s20 }
   0x6   :  { %p530_p1 = scmp.lt.u32.totalorder %s526_s23, %s768_s1 }
   0x8   :  { %p532_p2 = pnand %p530_p1, %p527_p0 }
   0xa   :  { %535 = shalt.err (!%p532_p2)
}
   0xb   :  { %s536_s10 = scalar_lea.vmem %s36_s20, 768  ;;  %p541_p4 = scmp.lt.s32.totalorder %s36_s20, %s36_s20 }
   0xc   :  { %p537_p3 = scmp.ne.s32.totalorder %s36_s20, %s536_s10  ;;  %p542_p5 = scmp.lt.s32.totalorder %s536_s10, %s536_s10 }
   0xe   :  { %p543_p6 = por %p542_p5, %p541_p4 }
  0x10   :  { %p544_p7 = pnand %p543_p6, %p537_p3 }
  0x12   :  { %547 = shalt.err (!%p544_p7)
}
  0x13   :  { %s597_s28 = smov 256   ;;  %s598_s29 = smov 16  }
  0x14   :  { %41 = dma.hbm_to_vmem [thread:$0]  %s768_s1, 768, %s36_s20, [#allocation6], %s597_s28, %s597_s28, %s598_s29  }
  0x15   :  { %s599_s13 = smov [#allocation3]   ;;  %s600_s15 = smov [#allocation7]  }
  0x16   :  { %s26_s14 = sshll.u32 %s599_s13, 4  ;;  %s53_s16 = sshll.u32 %s600_s15, 4  ;;  %s27_s14 = int_to_ptr.vmem [resolvable:$true] %s26_s14  ;;  %s54_s16 = int_to_ptr.vmem [resolvable:$true] %s53_s16 }
  0x17   :  { %s548_s19 = scalar_lea.hbm %s767_s0, 128 }
  0x18   :  { %p549_p8 = scmp.ne.s32.totalorder %s767_s0, %s548_s19  ;;  %p552_p9 = scmp.lt.u32.totalorder %s548_s19, %s767_s0 }
  0x1a   :  { %p554_p10 = pnand %p552_p9, %p549_p8 }
  0x1c   :  { %557 = shalt.err (!%p554_p10)
}
  0x1d   :  { %s558_s1 = scalar_lea.vmem %s27_s14, 128  ;;  %p563_p12 = scmp.lt.s32.totalorder %s27_s14, %s27_s14 }
  0x1e   :  { %p559_p11 = scmp.ne.s32.totalorder %s27_s14, %s558_s1  ;;  %p564_p13 = scmp.lt.s32.totalorder %s558_s1, %s558_s1 }
  0x20   :  { %p565_p0 = por %p564_p13, %p563_p12 }
  0x22   :  { %p566_p1 = pnand %p565_p0, %p559_p11 }
  0x24   :  { %569 = shalt.err (!%p566_p1)
}
  0x25   :  { %29 = dma.hbm_to_vmem [thread:$0]  %s767_s0, 128, %s27_s14, [#allocation4]  }
  0x26   :  { %s570_s10 = scalar_lea.hbm %s772_s5, 8192 }
  0x27   :  { %p571_p2 = scmp.ne.s32.totalorder %s772_s5, %s570_s10  ;;  %p574_p3 = scmp.lt.u32.totalorder %s570_s10, %s772_s5 }
  0x29   :  { %p576_p4 = pnand %p574_p3, %p571_p2 }
  0x2b   :  { %579 = shalt.err (!%p576_p4)
}
  0x2c   :  { %s580_s17 = scalar_lea.vmem %s54_s16, 8192  ;;  %p585_p6 = scmp.lt.s32.totalorder %s54_s16, %s54_s16 }
  0x2d   :  { %p581_p5 = scmp.ne.s32.totalorder %s54_s16, %s580_s17  ;;  %p586_p7 = scmp.lt.s32.totalorder %s580_s17, %s580_s17 }
  0x2f   :  { %p587_p8 = por %p586_p7, %p585_p6 }
  0x31   :  { %p588_p9 = pnand %p587_p8, %p581_p5 }
  0x33   :  { %591 = shalt.err (!%p588_p9)
}
  0x34   :  { %59 = dma.hbm_to_vmem [thread:$0]  %s772_s5, 8192, %s54_s16, [#allocation6], %s597_s28, %s597_s28, %s598_s29  }
  0x35   :  { %592 = dma.done.wait [#allocation4], 128  }
  0x36   :  { %593 = vsyncadd [#allocation4], 4294967168 }
  0x37   :  { %594 = dma.done.wait [#allocation6], 8960  }
  0x38   :  { %595 = vsyncadd [#allocation6], 4294958336  ;;  %v601_v1 = vmov 0.0   ;;  %v81_v2 = vld [vmem:[#allocation5 + $0x8] sm:$0xff]  ;;  %v83_v3 = vld [vmem:[#allocation5 + $0x18] sm:$0xff]  ;;  %vm98_vm0 = vcmask 195584   ;;  %v88_v11 = vlaneseq }
  0x39   :  { %166 = vmatprep.mubr.f32.mxu0 %v601_v1  ;;  %v80_v4 = vld [vmem:[#allocation5] sm:$0xff]  ;;  %v448_v5 = vpack.c.bf16 %v83_v3, %v81_v2  ;;  %v82_v6 = vld [vmem:[#allocation5 + $0x10] sm:$0xff]  ;;  %v85_v8 = vld [vmem:[#allocation5 + $0x28] sm:$0xff]  ;;  %vm438_vm1 = vcmask 7168  }
  0x3a   :  { %v450_v7 = vpack.c.bf16 %v82_v6, %v80_v4  ;;  %v84_v9 = vld [vmem:[#allocation5 + $0x20] sm:$0xff]  ;;  %v79_v10 = vld [vmem:[#allocation3] sm:$0xff]  ;;  %v89_v12 = vshrl.u32 %v88_v11, 7  ;;  %v223_v24 = vld [vmem:[#allocation7 + $0x18] sm:$0xff] }
  0x3b   :  { %449 = vmatprep.subr.bf16.mxu0 %v448_v5  ;;  %v86_v14 = vld [vmem:[%s769_s2] sm:$0x3]  ;;  %v222_v27 = vld [vmem:[#allocation7 + $0x10] sm:$0xff]  ;;  %v227_v29 = vld [vmem:[#allocation7 + $0x38] sm:$0xff] }
  0x3c   :  { %451 = vmatpush1.bf16.msra.mxu0 %v450_v7  ;;  %v707_v13 = vsub.s32 0, %v89_v12  ;;  %v712_v15 = vsub.s32 1, %v89_v12  ;;  %v221_v23 = vld [vmem:[#allocation7 + $0x8] sm:$0xff]  ;;  %v220_v25 = vld [vmem:[#allocation7] sm:$0xff]  ;;  %v226_v33 = vld [vmem:[#allocation7 + $0x30] sm:$0xff] }
  0x3d   :  { %106 = vmatprep.subr.mxu0 %v85_v8  ;;  %v452_v26 = vpack.c.bf16 %v223_v24, %v221_v23  ;;  %v225_v28 = vld [vmem:[#allocation7 + $0x28] sm:$0xff]  ;;  %v454_v30 = vpack.c.bf16 %v222_v27, %v220_v25  ;;  %v224_v32 = vld [vmem:[#allocation7 + $0x20] sm:$0xff]  ;;  %v231_v35 = vld [vmem:[#allocation7 + $0x58] sm:$0xff] }
  0x3e   :  { %v91_v16 = vrot.slane %v86_v14, %v707_v13  ;;  %v95_v17 = vrot.slane %v86_v14, %v712_v15  ;;  %v456_v31 = vpack.c.bf16 %v227_v29, %v225_v28  ;;  %v229_v34 = vld [vmem:[#allocation7 + $0x48] sm:$0xff]  ;;  %v458_v36 = vpack.c.bf16 %v226_v33, %v224_v32  ;;  %v228_v38 = vld [vmem:[#allocation7 + $0x40] sm:$0xff]  ;;  %v230_v39 = vld [vmem:[#allocation7 + $0x50] sm:$0xff] }
  0x3f   :  { %453 = vmatprep.subr.bf16.mxu1 %v452_v26  ;;  %v460_v37 = vpack.c.bf16 %v231_v35, %v229_v34  ;;  %v233_v40 = vld [vmem:[#allocation7 + $0x68] sm:$0xff]  ;;  %v235_v41 = vld [vmem:[#allocation7 + $0x78] sm:$0xff]  ;;  %v462_v42 = vpack.c.bf16 %v230_v39, %v228_v38  ;;  %v232_v44 = vld [vmem:[#allocation7 + $0x60] sm:$0xff] }
  0x40   :  { %107 = vmatpush1.msra.mxu0 %v84_v9  ;;  %455 = vmatpush1.bf16.msra.mxu1 %v454_v30  ;;  %v464_v43 = vpack.c.bf16 %v235_v41, %v233_v40  ;;  %v234_v45 = vld [vmem:[#allocation7 + $0x70] sm:$0xff]  ;;  %v237_v46 = vld [vmem:[#allocation7 + $0x88] sm:$0xff]  ;;  %v239_v47 = vld [vmem:[#allocation7 + $0x98] sm:$0xff] }
  0x41   :  { %446 = vmatmul.mubr.msk.f32.vlgmr.msra.gmra.mrb[0].mxu0 %vm98_vm0, %v79_v10  ;;  %457 = vmatprep.subr.bf16.mxu1 %v456_v31  ;;  %v466_v48 = vpack.c.bf16 %v234_v45, %v232_v44  ;;  %v468_v49 = vpack.c.bf16 %v239_v47, %v237_v46  ;;  %v236_v50 = vld [vmem:[#allocation7 + $0x80] sm:$0xff]  ;;  %v238_v51 = vld [vmem:[#allocation7 + $0x90] sm:$0xff]  ;;  %v241_v52 = vld [vmem:[#allocation7 + $0xa8] sm:$0xff] }
  0x42   :  { %v243_v53 = vld [vmem:[#allocation7 + $0xb8] sm:$0xff]  ;;  %v470_v54 = vpack.c.bf16 %v238_v51, %v236_v50  ;;  %v240_v56 = vld [vmem:[#allocation7 + $0xa0] sm:$0xff]  ;;  %v242_v57 = vld [vmem:[#allocation7 + $0xb0] sm:$0xff] }
  0x43   :  { %v472_v55 = vpack.c.bf16 %v243_v53, %v241_v52  ;;  %v245_v58 = vld [vmem:[#allocation7 + $0xc8] sm:$0xff]  ;;  %v247_v59 = vld [vmem:[#allocation7 + $0xd8] sm:$0xff]  ;;  %v474_v60 = vpack.c.bf16 %v242_v57, %v240_v56  ;;  %v244_v62 = vld [vmem:[#allocation7 + $0xc0] sm:$0xff] }
  0x44   :  { %459 = vmatpush1.bf16.msra.mxu1 %v458_v36  ;;  %v476_v61 = vpack.c.bf16 %v247_v59, %v245_v58  ;;  %v246_v63 = vld [vmem:[#allocation7 + $0xd0] sm:$0xff]  ;;  %v249_v0 = vld [vmem:[#allocation7 + $0xe8] sm:$0xff]  ;;  %v251_v1 = vld [vmem:[#allocation7 + $0xf8] sm:$0xff] }
  0x45   :  { %461 = vmatprep.subr.bf16.mxu1 %v460_v37  ;;  %v478_v2 = vpack.c.bf16 %v246_v63, %v244_v62  ;;  %v480_v3 = vpack.c.bf16 %v251_v1, %v249_v0  ;;  %v248_v4 = vld [vmem:[#allocation7 + $0xe0] sm:$0xff]  ;;  %v250_v5 = vld [vmem:[#allocation7 + $0xf0] sm:$0xff]  ;;  %v253_v6 = vld [vmem:[#allocation7 + $0x108] sm:$0xff] }
  0x46   :  { %v255_v7 = vld [vmem:[#allocation7 + $0x118] sm:$0xff]  ;;  %v482_v8 = vpack.c.bf16 %v250_v5, %v248_v4  ;;  %v252_v10 = vld [vmem:[#allocation7 + $0x100] sm:$0xff]  ;;  %v254_v11 = vld [vmem:[#allocation7 + $0x110] sm:$0xff] }
  0x47   :  { %v484_v9 = vpack.c.bf16 %v255_v7, %v253_v6  ;;  %v257_v12 = vld [vmem:[#allocation7 + $0x128] sm:$0xff]  ;;  %v259_v14 = vld [vmem:[#allocation7 + $0x138] sm:$0xff]  ;;  %v260_v33 = vld [vmem:[#allocation7 + $0x140] sm:$0xff] }
  0x48   :  { %463 = vmatpush1.bf16.msra.mxu1 %v462_v42  ;;  %v261_v30 = vld [vmem:[#allocation7 + $0x148] sm:$0xff]  ;;  %v263_v31 = vld [vmem:[#allocation7 + $0x158] sm:$0xff]  ;;  %v262_v34 = vld [vmem:[#allocation7 + $0x150] sm:$0xff] }
  0x49   :  { %465 = vmatprep.subr.bf16.mxu1 %v464_v43  ;;  %v492_v32 = vpack.c.bf16 %v263_v31, %v261_v30  ;;  %v494_v35 = vpack.c.bf16 %v262_v34, %v260_v33  ;;  %v267_v36 = vld [vmem:[#allocation7 + $0x178] sm:$0xff]  ;;  %v264_v37 = vld [vmem:[#allocation7 + $0x160] sm:$0xff]  ;;  %v266_v38 = vld [vmem:[#allocation7 + $0x170] sm:$0xff] }
  0x4a   :  { %v498_v39 = vpack.c.bf16 %v266_v38, %v264_v37  ;;  %v269_v40 = vld [vmem:[#allocation7 + $0x188] sm:$0xff]  ;;  %v271_v41 = vld [vmem:[#allocation7 + $0x198] sm:$0xff]  ;;  %v268_v42 = vld [vmem:[#allocation7 + $0x180] sm:$0xff] }
  0x4b   :  { %v500_v43 = vpack.c.bf16 %v271_v41, %v269_v40  ;;  %v270_v44 = vld [vmem:[#allocation7 + $0x190] sm:$0xff]  ;;  %v273_v45 = vld [vmem:[#allocation7 + $0x1a8] sm:$0xff]  ;;  %v275_v46 = vld [vmem:[#allocation7 + $0x1b8] sm:$0xff] }
  0x4c   :  { %467 = vmatpush1.bf16.msra.mxu1 %v466_v48  ;;  %v502_v47 = vpack.c.bf16 %v270_v44, %v268_v42  ;;  %v504_v48 = vpack.c.bf16 %v275_v46, %v273_v45  ;;  %v274_v50 = vld [vmem:[#allocation7 + $0x1b0] sm:$0xff]  ;;  %v277_v51 = vld [vmem:[#allocation7 + $0x1c8] sm:$0xff]  ;;  %v279_v52 = vld [vmem:[#allocation7 + $0x1d8] sm:$0xff] }
  0x4d   :  { %469 = vmatprep.subr.bf16.mxu1 %v468_v49  ;;  %v272_v49 = vld [vmem:[#allocation7 + $0x1a0] sm:$0xff]  ;;  %v278_v56 = vld [vmem:[#allocation7 + $0x1d0] sm:$0xff]  ;;  %v281_v57 = vld [vmem:[#allocation7 + $0x1e8] sm:$0xff] }
  0x4e   :  { %v506_v53 = vpack.c.bf16 %v274_v50, %v272_v49  ;;  %v283_v58 = vld [vmem:[#allocation7 + $0x1f8] sm:$0xff]  ;;  %v282_v62 = vld [vmem:[#allocation7 + $0x1f0] sm:$0xff]  ;;  %v174_v6 = vld [vmem:[%s771_s4] sm:$0x3] }
  0x4f   :  { %v367_v38 = vld [vmem:[%s774_s7] sm:$0x3] }
  0x50   :  { %471 = vmatpush1.bf16.msra.mxu1 %v470_v54  ;;  %v508_v54 = vpack.c.bf16 %v279_v52, %v277_v51  ;;  %v391_v40 = vrot.slane %v367_v38, %v712_v15  ;;  %v368_v41 = vld [vmem:[%s775_s8] sm:$0x3] }
  0x51   :  { %473 = vmatprep.subr.bf16.mxu1 %v472_v55  ;;  %v276_v55 = vld [vmem:[#allocation7 + $0x1c0] sm:$0xff]  ;;  %v402_v45 = vrot.slane %v368_v41, %v707_v13  ;;  %v406_v46 = vrot.slane %v368_v41, %v712_v15 }
  0x52   :  { %v510_v59 = vpack.c.bf16 %v278_v56, %v276_v55 }
  0x54   :  { %475 = vmatpush1.bf16.msra.mxu1 %v474_v60  ;;  %v512_v60 = vpack.c.bf16 %v283_v58, %v281_v57 }
  0x55   :  { %477 = vmatprep.subr.bf16.mxu1 %v476_v61  ;;  %v280_v61 = vld [vmem:[#allocation7 + $0x1e0] sm:$0xff] }
  0x56   :  { %v514_v63 = vpack.c.bf16 %v282_v62, %v280_v61 }
  0x58   :  { %479 = vmatpush1.bf16.msra.mxu1 %v478_v2 }
  0x59   :  { %481 = vmatprep.subr.bf16.mxu1 %v480_v3  ;;  %v173_v3 = vld [vmem:[%s770_s3] sm:$0x3] }
  0x5a   :  { %v194_v4 = vrot.slane %v173_v3, %v707_v13  ;;  %v198_v5 = vrot.slane %v173_v3, %v712_v15 }
  0x5c   :  { %483 = vmatpush1.bf16.msra.mxu1 %v482_v8 }
  0x5d   :  { %485 = vmatprep.subr.bf16.mxu1 %v484_v9  ;;  %v209_v9 = vrot.slane %v174_v6, %v707_v13 }
 0x114   :  { %v168_v18 = vpop.f32.mrb[0].mxu0 }
 0x115   :  { %v716_v19 = vadd.f32 %v168_v18, %v91_v16  ;;  %v170_v20 = vpop.f32.mrb[1].mxu0  ;;  %v486_v16 = vpack.c.bf16 %v254_v11, %v252_v10  ;;  %v256_v18 = vld [vmem:[#allocation7 + $0x120] sm:$0xff]  ;;  %v213_v10 = vrot.slane %v174_v6, %v712_v15 }
 0x116   :  { %v718_v21 = vadd.f32 %v170_v20, %v95_v17  ;;  %v488_v17 = vpack.c.bf16 %v259_v14, %v257_v12  ;;  %v258_v20 = vld [vmem:[#allocation7 + $0x130] sm:$0xff] }
 0x117   :  { %487 = vmatpush1.bf16.msra.mxu1 %v486_v16 }
 0x118   :  { %v175_v22 = vadd.f32 %v718_v21, %v716_v19  ;;  %489 = vmatprep.subr.bf16.mxu1 %v488_v17 }
 0x11a   :  { %176 = vadd.xlane.f32.xlu0 %v175_v22  ;;  %v490_v22 = vpack.c.bf16 %v258_v20, %v256_v18 }
 0x11c   :  { %491 = vmatpush1.bf16.msra.mxu1 %v490_v22  ;;  %v284_v22 = vld [vmem:[%s773_s6] sm:$0x3] }
 0x11d   :  { %493 = vmatprep.subr.bf16.mxu1 %v492_v32 }
 0x120   :  { %495 = vmatpush1.bf16.msra.mxu1 %v494_v35 }
 0x1a7   :  { %v177_v23 = vpop.xlane.xlu0 %176 }
 0x1a8   :  { %v179_v24 = vmul.f32 0.00390625, %v177_v23  ;;  %v289_v23 = vrot.slane %v284_v22, %v707_v13 }
 0x1aa   :  { %v723_v25 = vsub.f32 %v716_v19, %v179_v24  ;;  %v726_v26 = vsub.f32 %v718_v21, %v179_v24  ;;  %v265_v19 = vld [vmem:[#allocation7 + $0x168] sm:$0xff]  ;;  %v293_v24 = vrot.slane %v284_v22, %v712_v15 }
 0x1ab   :  { %v496_v21 = vpack.c.bf16 %v267_v36, %v265_v19 }
 0x1ac   :  { %v182_v27 = vmul.f32 %v723_v25, %v723_v25  ;;  %v183_v28 = vmul.f32 %v726_v26, %v726_v26 }
 0x1ad   :  { %497 = vmatprep.subr.bf16.mxu1 %v496_v21 }
 0x1ae   :  { %v184_v29 = vadd.f32 %v183_v28, %v182_v27  ;;  %499 = vmatpush1.bf16.msra.mxu1 %v498_v39  ;;  %v387_v39 = vrot.slane %v367_v38, %v707_v13 }
 0x1af   :  { %501 = vmatprep.subr.bf16.mxu1 %v500_v43 }
 0x1b0   :  { %185 = vadd.xlane.f32.xlu0 %v184_v29 }
 0x1b2   :  { %503 = vmatpush1.bf16.msra.mxu1 %v502_v47  ;;  %v413_v47 = vld [vmem:[%s776_s9] sm:$0x3] }
 0x1b3   :  { %505 = vmatprep.subr.bf16.mxu1 %v504_v48  ;;  %v418_v52 = vrot.slane %v413_v47, %v707_v13 }
 0x1b6   :  { %507 = vmatpush1.bf16.msra.mxu1 %v506_v53  ;;  %v422_v53 = vrot.slane %v413_v47, %v712_v15 }
 0x1b7   :  { %509 = vmatprep.subr.bf16.mxu1 %v508_v54 }
 0x1ba   :  { %511 = vmatpush1.bf16.msra.mxu1 %v510_v59  ;;  %v447_v59 = vld [vmem:[#allocation2] ss:$0 sm:$0xff] }
 0x1bb   :  { %513 = vmatprep.subr.bf16.mxu1 %v512_v60 }
 0x1be   :  { %515 = vmatpush1.bf16.msra.mxu1 %v514_v63 }
 0x23d   :  { %v186_v0 = vpop.xlane.xlu0 %185 }
 0x23e   :  { %v187_v1 = vmul.f32 0.00390625, %v186_v0 }
 0x240   :  { %v188_v2 = vadd.f32 1e-05, %v187_v1 }
 0x242   :  { %522 = vrsqrt.f32 %v188_v2 }
 0x24c   :  { %v523_v7 = vpop.eup %522 }
 0x24d   :  { %v202_v8 = vmul.f32 %v523_v7, %v198_v5  ;;  %v201_v11 = vmul.f32 %v523_v7, %v194_v4 }
 0x24f   :  { %v204_v12 = vmul.f32 %v202_v8, %v726_v26  ;;  %v203_v14 = vmul.f32 %v201_v11, %v723_v25 }
 0x251   :  { %v217_v16 = vadd.f32 %v213_v10, %v204_v12  ;;  %v216_v17 = vadd.f32 %v209_v9, %v203_v14 }
 0x253   :  { %v219_v18 = vmax.f32 %v217_v16, 0.0  ;;  %v218_v20 = vmax.f32 %v216_v17, 0.0 }
 0x255   :  { %360 = vmatprep.mubr.f32.mxu1 %v219_v18 }
 0x256   :  { %361 = vmatmul.mubr.f32.vlgmr.msra.gmra.mrb[0].mxu1 %v218_v20 }
 0x329   :  { %v362_v27 = vpop.f32.mrb[0].mxu1 }
 0x32a   :  { %v363_v28 = vadd.f32 %v362_v27, %v289_v23  ;;  %v364_v29 = vpop.f32.mrb[1].mxu1 }
 0x32b   :  { %v365_v26 = vadd.f32 %v364_v29, %v293_v24 }
 0x32d   :  { %v369_v30 = vadd.f32 %v365_v26, %v363_v28 }
 0x32f   :  { %370 = vadd.xlane.f32.xlu1 %v369_v30 }
 0x3bc   :  { %v371_v25 = vpop.xlane.xlu1 %370 }
 0x3bd   :  { %v372_v31 = vmul.f32 0.00390625, %v371_v25 }
 0x3bf   :  { %v373_v32 = vsub.f32 %v363_v28, %v372_v31  ;;  %v374_v33 = vsub.f32 %v365_v26, %v372_v31 }
 0x3c1   :  { %v375_v34 = vmul.f32 %v373_v32, %v373_v32  ;;  %v376_v35 = vmul.f32 %v374_v33, %v374_v33 }
 0x3c3   :  { %v377_v19 = vadd.f32 %v376_v35, %v375_v34 }
 0x3c5   :  { %378 = vadd.xlane.f32.xlu1 %v377_v19 }
 0x452   :  { %v379_v36 = vpop.xlane.xlu1 %378 }
 0x453   :  { %v380_v21 = vmul.f32 0.00390625, %v379_v36 }
 0x455   :  { %v381_v37 = vadd.f32 1e-05, %v380_v21 }
 0x457   :  { %524 = vrsqrt.f32 %v381_v37 }
 0x461   :  { %v525_v42 = vpop.eup %524 }
 0x462   :  { %v394_v43 = vmul.f32 %v525_v42, %v387_v39  ;;  %v395_v44 = vmul.f32 %v525_v42, %v391_v40 }
 0x464   :  { %v396_v48 = vmul.f32 %v394_v43, %v373_v32  ;;  %v397_v49 = vmul.f32 %v395_v44, %v374_v33 }
 0x466   :  { %v409_v50 = vadd.f32 %v402_v45, %v396_v48  ;;  %v410_v51 = vadd.f32 %v406_v46, %v397_v49 }
 0x468   :  { %v411_v54 = vmax.f32 %v409_v50, 0.0  ;;  %v412_v55 = vmax.f32 %v410_v51, 0.0 }
 0x46a   :  { %v425_v56 = vmul.f32 %v418_v52, %v411_v54  ;;  %v426_v57 = vmul.f32 %v422_v53, %v412_v55 }
 0x46c   :  { %v427_v58 = vadd.f32 %v426_v57, %v425_v56 }
 0x46e   :  { %428 = vadd.xlane.f32.xlu0 %v427_v58 }
 0x4fb   :  { %v429_v60 = vpop.xlane.xlu0 %428 }
 0x4fc   :  { %v437_v61 = vadd.f32 %v447_v59, %v429_v60 }
 0x4fe   :  { %439 = vst.msk [vmem:[%s778_s11] sm:$0xff] %vm438_vm1, %v437_v61 }
 0x4ff   :  { %444 = vsyncpa [#allocation4], 1 }
 0x500   :  { %445 = vsyncpa [#allocation6], 1 }

</bundles_post_ra>
